<compile_context>
chip_gen: v5e
topology: v5e:2x2
jax: 0.10.0
libtpu: 0.0.40
codegen_flags: <defaults>
</compile_context>

<pallas_src>
import jax
import jax.numpy as jnp
from jax import lax
from jax.experimental import pallas as pl
from jax.experimental.pallas import tpu as pltpu


# ---------------------------------------------------------------------------
# Kernels
# ---------------------------------------------------------------------------
# (tm, K_tile) x (tn, K_tile) -> (tm, tn), contracting the last dim of both,
# i.e. x @ W.T without ever materializing a transposed weight.
_CONTRACT_LAST = (((1,), (1,)), ((), ()))


def _linear_kernel_fullk(x_ref, w_ref, o_ref):
    """Full-K tile: single MXU dot per block, no accumulator round-trip."""
    x = x_ref[...]
    w = w_ref[...]
    if x.dtype != w.dtype:            # static (trace-time) decision
        x = x.astype(w.dtype)
    o_ref[...] = lax.dot_general(
        x, w, _CONTRACT_LAST, preferred_element_type=jnp.float32
    ).astype(o_ref.dtype)


def _linear_kernel_ktiled(x_ref, w_ref, o_ref, acc_ref):
    """K tiled along the last ('arbitrary') grid axis with an f32 accumulator."""
    k = pl.program_id(2)

    @pl.when(k == 0)
    def _():
        acc_ref[...] = jnp.zeros_like(acc_ref)

    x = x_ref[...]
    w = w_ref[...]
    if x.dtype != w.dtype:
        x = x.astype(w.dtype)
    acc_ref[...] += lax.dot_general(
        x, w, _CONTRACT_LAST, preferred_element_type=jnp.float32)

    @pl.when(k == pl.num_programs(2) - 1)
    def _():
        o_ref[...] = acc_ref[...].astype(o_ref.dtype)


# ---------------------------------------------------------------------------
# Tiling helpers
# ---------------------------------------------------------------------------
def _round_up(x, m):
    return ((x + m - 1) // m) * m


def _vmem_limit_bytes():
    """Generation-aware scoped-VMEM limit: 75% of physical per-core VMEM."""
    cap = 64 * 1024 * 1024                      # safe fallback (= v7x physical)
    try:
        info = pltpu.get_tpu_info()
        cap_q = int(getattr(info, "vmem_capacity_bytes", 0))
        if cap_q > 0:
            cap = cap_q
    except Exception:
        pass
    return (cap * 3) // 4


def _tile_bytes(tm, tn, tk, xb, wb, ob, k_tiled):
    """Double-buffered input/output tiles (+ f32 accumulator if K is tiled)."""
    b = 2 * (tm * tk * xb + tk * tn * wb + tm * tn * ob)
    if k_tiled:
        b += tm * tn * 4
    return b


# ---------------------------------------------------------------------------
# One-time weight preparation (outside the hot path)
# ---------------------------------------------------------------------------
def prepare_brick_lp_weight(weight, compute_dtype=jnp.bfloat16):
    """Cast the PyTorch-layout (out, in) weight to the MXU compute dtype once.

    No transpose is required: the kernel contracts against the (N, K) layout
    directly, so the hot path pays zero weight copies through HBM.
    Pass compute_dtype=None to keep exact f32 numerics.
    """
    if compute_dtype is None:
        return weight
    return weight.astype(compute_dtype)


# ---------------------------------------------------------------------------
# Wrapper: BrickLP.forward
# ---------------------------------------------------------------------------
def brick_lp(x, weight, *, out_dtype=None, k_tile=None):
    """y = x @ weight.T  (torch.nn.Linear(..., bias=False) semantics).

    x:      (..., in_features)
    weight: (out_features, in_features)  -- PyTorch layout, ideally pre-cast
            once via prepare_brick_lp_weight (no transpose ever needed).
    k_tile: optional forced K tile (testing / very large K).
    """
    orig_shape = x.shape
    K = orig_shape[-1]
    N, K_w = weight.shape
    assert K_w == K, "weight must be (out_features, in_features)"
    out_dtype = x.dtype if out_dtype is None else out_dtype

    M = 1
    for d in orig_shape[:-1]:
        M *= d
    x2d = x.reshape(M, K)

    xb = jnp.dtype(x2d.dtype).itemsize
    wb = jnp.dtype(weight.dtype).itemsize
    ob = jnp.dtype(out_dtype).itemsize

    # --- M tile (pad M to a friendly multiple when it is not aligned) ------
    tm, Mp = None, M
    for t in (1024, 512, 256, 128):
        if M % t == 0:
            tm, Mp = t, M
            break
    if tm is None:
        if M <= 1024:
            Mp = _round_up(M, 8)
            tm = Mp
        else:
            Mp = _round_up(M, 256)
            tm = 256

    # --- N tile -------------------------------------------------------------
    tn = N
    for t in (512, 256, 128):
        if N % t == 0:
            tn = t
            break
    # TODO(synk): a very large N that is not a 128-multiple falls back to a
    # full-N block; pad N (and the weight) once at setup time if that occurs.

    # --- K tiling decision + VMEM fit ---------------------------------------
    vmem_limit = _vmem_limit_bytes()
    budget = (vmem_limit * 7) // 10     # tiles must sit well under the limit

    tm_candidates = []
    for t in (tm, 1024, 512, 256, 128, 64, 32, 16, 8):
        if t <= tm and Mp % t == 0 and t not in tm_candidates:
            tm_candidates.append(t)

    k_tiled, tk = False, K
    if k_tile is not None and 0 < k_tile < K and K % k_tile == 0:
        k_tiled, tk = True, k_tile
    elif _tile_bytes(tm_candidates[-1], tn, K, xb, wb, ob, False) > budget:
        # even the smallest M tile cannot hold a full-K slab -> tile K
        k_tiled = True
        for t in (512, 256, 128):
            if K % t == 0:
                tk = t
                break
        if tk == K:
            k_tiled = False          # odd K: keep full-K, skip useless acc

    for t in tm_candidates:          # largest tm that fits the budget
        if _tile_bytes(t, tn, tk, xb, wb, ob, k_tiled) <= budget:
            tm = t
            break
    else:
        tm = tm_candidates[-1]

    # --- guarantee >= 2 parallel blocks for v7x megacore --------------------
    if (Mp // tm) * (N // tn) < 2:
        if tm % 16 == 0:
            tm //= 2
        elif tn % 256 == 0:
            tn //= 2

    if Mp != M:
        x2d = jnp.pad(x2d, ((0, Mp - M), (0, 0)))

    cost = pl.CostEstimate(
        flops=2 * M * N * K,
        transcendentals=0,
        bytes_accessed=M * K * xb + N * K * wb + M * N * ob,
    )

    if not k_tiled:
        grid = (Mp // tm, N // tn)
        out2d = pl.pallas_call(
            _linear_kernel_fullk,
            out_shape=jax.ShapeDtypeStruct((Mp, N), out_dtype),
            grid_spec=pltpu.PrefetchScalarGridSpec(
                num_scalar_prefetch=0,
                grid=grid,
                in_specs=[
                    pl.BlockSpec((tm, K), lambda i, j: (i, 0)),
                    pl.BlockSpec((tn, K), lambda i, j: (j, 0)),
                ],
                out_specs=pl.BlockSpec((tm, tn), lambda i, j: (i, j)),
            ),
            compiler_params=pltpu.CompilerParams(
                dimension_semantics=("parallel", "parallel"),
                vmem_limit_bytes=int(vmem_limit),
            ),
            cost_estimate=cost,
        )(x2d, weight)
    else:
        grid = (Mp // tm, N // tn, K // tk)
        out2d = pl.pallas_call(
            _linear_kernel_ktiled,
            out_shape=jax.ShapeDtypeStruct((Mp, N), out_dtype),
            grid_spec=pltpu.PrefetchScalarGridSpec(
                num_scalar_prefetch=0,
                grid=grid,
                in_specs=[
                    pl.BlockSpec((tm, tk), lambda i, j, k: (i, k)),
                    pl.BlockSpec((tn, tk), lambda i, j, k: (j, k)),
                ],
                out_specs=pl.BlockSpec((tm, tn), lambda i, j, k: (i, j)),
                scratch_shapes=[pltpu.VMEM((tm, tn), jnp.float32)],
            ),
            compiler_params=pltpu.CompilerParams(
                dimension_semantics=("parallel", "parallel", "arbitrary"),
                vmem_limit_bytes=int(vmem_limit),
            ),
            cost_estimate=cost,
        )(x2d, weight)

    if Mp != M:
        out2d = out2d[:M]
    return out2d.reshape(*orig_shape[:-1], N)


# ---------------------------------------------------------------------------
# Pure-JAX reference (PyTorch Linear semantics)
# ---------------------------------------------------------------------------
def reference_brick_lp(x, weight):
    return jnp.einsum("...k,nk->...n", x, weight)


# ---------------------------------------------------------------------------
if __name__ == "__main__":
    # --- small config consistent with the module (hidden = 32), pure f32 ----
    B, S, E = 2, 8, 32
    kx, kw = jax.random.split(jax.random.PRNGKey(0))
    x_small = jax.random.normal(kx, (B, S, E), jnp.float32)
    w_small = 0.02 * jax.random.normal(kw, (E, E), jnp.float32)   # (out, in)

    out_small = jax.block_until_ready(brick_lp(x_small, w_small))
    ref_small = reference_brick_lp(x_small, w_small)
    if out_small.shape != ref_small.shape:
        raise AssertionError("shape mismatch")
    if not bool(jnp.allclose(out_small, ref_small, atol=1e-2, rtol=1e-2)):
        raise AssertionError("Pallas BrickLP (small/f32) does not match reference")

    # --- larger config, bf16 weight prepared once, full-K fast path ---------
    B2, S2, E2 = 4, 256, 1024
    kx2, kw2 = jax.random.split(jax.random.PRNGKey(1))
    x_big = jax.random.normal(kx2, (B2, S2, E2), jnp.float32)
    w_big = 0.02 * jax.random.normal(kw2, (E2, E2), jnp.float32)
    w_big_prep = prepare_brick_lp_weight(w_big)   # one-time cast, NO transpose

    out_big = jax.block_until_ready(brick_lp(x_big, w_big_prep))
    # Reference on the same bf16-rounded inputs so the check isolates kernel
    # correctness (tiling / indexing) from bf16 quantization of the inputs.
    x_r = x_big.astype(jnp.bfloat16).astype(jnp.float32)
    w_r = w_big.astype(jnp.bfloat16).astype(jnp.float32)
    ref_big = reference_brick_lp(x_r, w_r)
    if not bool(jnp.allclose(out_big, ref_big, atol=2e-2, rtol=2e-2)):
        raise AssertionError("Pallas BrickLP (full-K) does not match reference")

    # --- exercise the K-tiled accumulator path explicitly -------------------
    out_kt = jax.block_until_ready(brick_lp(x_big, w_big_prep, k_tile=256))
    if not bool(jnp.allclose(out_kt, ref_big, atol=2e-2, rtol=2e-2)):
        raise AssertionError("Pallas BrickLP (K-tiled) does not match reference")

    print("KERNEL_OK")
</pallas_src>

<mosaic_0001>
module attributes {stable_mosaic.version = 11 : i64} {
  func.func @_linear_kernel_fullk(%arg0: i32, %arg1: i32, %arg2: memref<8x32xf32, #tpu.memory_space<vmem>>, %arg3: memref<32x32xf32, #tpu.memory_space<vmem>>, %arg4: memref<8x32xf32, #tpu.memory_space<vmem>>) attributes {dimension_semantics = [#tpu.dimension_semantics<parallel>, #tpu.dimension_semantics<parallel>], iteration_bounds = array<i64: 2, 1>, scalar_prefetch = 0 : i64, scratch_operands = 0 : i64, tpu.core_type = #tpu.core_type<tc>, window_params = [{transform_indices = @transform_0, window_bounds = array<i64: 8, 32>}, {transform_indices = @transform_1, window_bounds = array<i64: 32, 32>}, {transform_indices = @transform_2, window_bounds = array<i64: 8, 32>}]} {
    %c0 = arith.constant 0 : index
    %c0_0 = arith.constant 0 : index
    %0 = vector.load %arg2[%c0, %c0_0] : memref<8x32xf32, #tpu.memory_space<vmem>>, vector<8x32xf32>
    %c0_1 = arith.constant 0 : index
    %c0_2 = arith.constant 0 : index
    %1 = vector.load %arg3[%c0_1, %c0_2] : memref<32x32xf32, #tpu.memory_space<vmem>>, vector<32x32xf32>
    %cst = arith.constant dense<0.000000e+00> : vector<8x32xf32>
    %2 = tpu.matmul %0, %1, %cst {dimension_numbers = #tpu.dot_dimension_numbers<[1], [1], [0], [0], [0, 0, 1, 0], [], []>} : vector<8x32xf32>, vector<32x32xf32>, vector<8x32xf32> -> vector<8x32xf32>
    %c0_3 = arith.constant 0 : index
    %c0_4 = arith.constant 0 : index
    %3 = vector.load %arg4[%c0_3, %c0_4] : memref<8x32xf32, #tpu.memory_space<vmem>>, vector<8x32xf32>
    tpu.vector_store %arg4[%c0_3, %c0_4], %2 {strides = array<i32>} : memref<8x32xf32, #tpu.memory_space<vmem>>, vector<8x32xf32>,
    return
  }
  func.func @transform_0(%arg0: i32, %arg1: i32) -> (i32, i32) {
    %c0_i32 = arith.constant 0 : i32
    %c0_i32_0 = arith.constant 0 : i32
    return %arg0, %c0_i32 : i32, i32
  }
  func.func @transform_1(%arg0: i32, %arg1: i32) -> (i32, i32) {
    %c0_i32 = arith.constant 0 : i32
    %c0_i32_0 = arith.constant 0 : i32
    return %arg1, %c0_i32 : i32, i32
  }
  func.func @transform_2(%arg0: i32, %arg1: i32) -> (i32, i32) {
    %c0_i32 = arith.constant 0 : i32
    return %arg0, %arg1 : i32, i32
  }
}

</mosaic_0001>

<bundles_post_ra>
// kernel: tpu_custom_call.1
= control target key start
LH: loop header
LB: loop body
LE: loop exit
PB: predicated region body
PF: predicated region fallthrough
CT: control target
= control target key end

     0   :  { %7 = vsyncpa [#allocation3], 0  ;;  %s761_s0 = inlined_call_operand.hbm [shape: f32[16,32], index: 0, kind: input, shape index: {}]   ;;  %s762_s1 = inlined_call_operand.hbm [shape: f32[32,32], index: 1, kind: input, shape index: {}]   ;;  %s763_s2 = inlined_call_operand.hbm [shape: f32[16,32], index: 2, kind: output, shape index: {}]  }
   0x1   :  { %9 = vsyncpa [#allocation3 + $0x1], 0 }
   0x2   :  { %10 = vsyncpa [#allocation6], 0 }
   0x3   :  { %11 = vsyncpa [#allocation4], 0 }
   0x4   :  { %13 = vsyncpa [#allocation4 + $0x1], 0  ;;  %s612_s9 = smov 0   ;;  %s614_s10 = smov 0  }
   0x5   :  { %s616_s11 = smov 0   ;;  %s618_s12 = smov 0  }
   0x6   :  { %s620_s13 = smov 0   ;;  %s622_s14 = smov 0  }
   0x7 LB: > { %s351_s15 = sadd.s32 4294967295, %s592_s14   ;;  %p353_p0 = scmp.ge.s32.totalorder %s592_s14, 1  ;;  %s592_s14 = sphi %s622_s14, %s19_s14   ;;  %s588_s13 = sphi %s620_s13, %s774_s13   ;;  %s584_s12 = sphi %s618_s12, %s773_s12   ;;  %s580_s11 = sphi %s616_s11, %s772_s11   ;;  %s576_s10 = sphi %s614_s10, %s771_s10   ;;  %s572_s9 = sphi %s612_s9, %s770_s9  }
   0x8   : > { %p644_p1 = scmp.eq.s32.totalorder %s351_s15, 0  ;;  %p116_p2 = scmp.lt.s32.totalorder %s592_s14, 3 }
   0x9   : > { %s130_s19 = sshll.u32 %s762_s1, 4  ;;  %s594_s21 = smov [#allocation5]   ;;  %s131_s19 = int_to_ptr.hbm [resolvable:$true] %s130_s19 }
   0xa   : > { %p652_p3 = pnand %p353_p0, %p116_p2  ;;  %s132_s22 = sshll.u32 %s594_s21, 4  ;;  %s133_s22 = int_to_ptr.vmem [resolvable:$true] %s132_s22 }
   0xb   : > { %p355_p6 = scmp.ge.s32.totalorder %s592_s14, 2  ;;  %s595_s23 = smov 128  }
   0xc   : > { %p379_p4 = pneg %p652_p3  ;;  %s596_s24 = smov 8  }
   0xd   : > { %s352_s25 = sadd.s32 4294967294, %s592_s14   ;;  %s31_s26 = sadd.s32 1, %s588_s13 }
   0xe   : > { %p380_p5 = pnand %p379_p4, %p644_p1  ;;  %s38_s27 = sadd.s32 1, %s580_s11 }
   0xf   : > { %p33_p7 = scmp.ge.s32.totalorder %s31_s26, 2  ;;  %p45_p8 = scmp.ne.s32.totalorder %s580_s11, %s576_s10 }
  0x10   : > { %382 = dma.hbm_to_vmem [thread:$0]  (!%p380_p5), %s131_s19, 512, %s133_s22, [#allocation6], %s595_s23, %s595_s23, %s596_s24  }
  0x11   : > { %p46_p9 = scmp.eq.s32.totalorder %s592_s14, 0  ;;  %p51_p10 = scmp.ne.s32.totalorder %s576_s10, %s572_s9 }
  0x12   : > { %s776_s26 = smov (%p33_p7, %s31_s26), 0  ;;  %p103_p13 = scmp.eq.s32.totalorder %s351_s15, 1 }
  0x13   : > { %p671_p11 = por %p46_p9, %p45_p8  ;;  %p677_p12 = por %p644_p1, %p51_p10 }
  0x14   : > { %s35_s30 = ssub.s32 %s588_s13, %s776_s26  ;;  %p109_p2 = scmp.eq.s32.totalorder %s352_s25, 1 }
  0x15   : > { %p36_p0 = scmp.eq.s32.totalorder %s35_s30, 0  ;;  %p683_p4 = por %p103_p13, %p45_p8 }
  0x16   : > { %p392_p5 = scmp.lt.s32.totalorder %s592_s14, 2  ;;  %p691_p7 = por %p109_p2, %p51_p10 }
  0x17   : > { %s689_s4 = scalar_select %p36_p0, %s580_s11, %s38_s27  }
  0x18   : > { %s146_s6 = sand.u32 1, %s580_s11   ;;  %s357_s8 = sshll.u32 %s588_s13, 3 }
  0x19   : > { %s356_s7 = sshll.u32 %s146_s6, 3  ;;  %s154_s15 = scalar_lea.hbm %s761_s0, %s357_s8 }
  0x1a   : > { %s150_s19 = scalar_lea.vmem [#allocation2], %s356_s7  ;;  %s156_s22 = sshll.u32 %s154_s15, 4  ;;  %s157_s22 = int_to_ptr.hbm [resolvable:$true] %s156_s22 }
  0x1b   : > { %s158_s21 = sshll.u32 %s150_s19, 4  ;;  %p384_p8 = pnand %p392_p5, %p671_p11  ;;  %s159_s21 = int_to_ptr.vmem [resolvable:$true] %s158_s21 }
  0x1c   : > { %s147_s23 = scalar_lea.sflag [#allocation3], %s146_s6  ;;  %167 = sbr.rel (%p652_p3) target bundleno = 181 (0xb5), region = 28 }
  0x1d   : > { %386 = dma.hbm_to_vmem [thread:$0]  (!%p384_p8), %s157_s22, 128, %s159_s21, %s147_s23  }
  0x1e   : > { %s705_s24 = sand.u32 (!%p652_p3), 1, %s576_s10  }
  0x1f   : > { %s359_s25 = sshll.u32 (!%p652_p3), %s705_s24, 3  ;;  %s170_s27 = scalar_lea.sflag (!%p652_p3), [#allocation3], %s705_s24 }
  0x20   : > { %s173_s30 = scalar_lea.vmem (!%p652_p3), [#allocation2], %s359_s25 }
  0x21   : > { %559 = dma.done.wait (%p677_p12), %s170_s27, 128  }
  0x22   : > { %561 = vsyncadd (%p677_p12), %s170_s27, 4294967168 }
  0x23   : > { %563 = dma.done.wait (%p644_p1), [#allocation6], 512  }
  0x24   : > { %565 = vsyncadd (%p644_p1), [#allocation6], 4294966784  ;;  %vm206_vm0 = vcmask 261120   ;;  %v205_v0 = vld [vmem:[#allocation5 + $0x18] sm:$0xff]  ;;  %v204_v1 = vld [vmem:[#allocation5 + $0x10] sm:$0xff]  ;;  %s368_s16 = sshll.u32 %s584_s12, 3 }
  0x25   : > { %362 = vmatpush.xpose.msk.msra.mxu0 %vm206_vm0, %v205_v0  ;;  %v203_v2 = vld [vmem:[#allocation5 + $0x8] sm:$0xff]  ;;  %v202_v3 = vld [vmem:[#allocation5] sm:$0xff]  ;;  %v201_v4 = vld [vmem:[%s173_s30] sm:$0xff]  ;;  %s255_s29 = scalar_lea.hbm %s763_s2, %s368_s16  ;;  %s199_s6 = scalar_lea.vmem [#allocation7], %s359_s25 }
  0x26   : > { %s257_s7 = sshll.u32 %s199_s6, 4  ;;  %s259_s8 = sshll.u32 %s255_s29, 4  ;;  %s258_s7 = int_to_ptr.vmem [resolvable:$true] %s257_s7  ;;  %s260_s8 = int_to_ptr.hbm [resolvable:$true] %s259_s8 }
  0x27   : > { %s244_s17 = scalar_lea.sflag [#allocation4], %s705_s24  ;;  %s520_s18 = sshra.s32 %s260_s8, 4  ;;  %s521_s18 = int_to_ptr.hbm [resolvable:$true] %s520_s18 }
  0x28   : > { %s522_s15 = scalar_lea.hbm %s521_s18, 8  ;;  %s526_s21 = scalar_lea.hbm %s763_s2, 16 }
  0x29   : > { %363 = vmatpush.xpose.msk.msra.mxu0 %vm206_vm0, %v204_v1  ;;  %p523_p1 = scmp.ne.s32.totalorder %s521_s18, %s522_s15  ;;  %p527_p10 = scmp.lt.s32.totalorder %s521_s18, %s763_s2 }
  0x2a   : > { %p528_p11 = scmp.lt.s32.totalorder %s526_s21, %s522_s15 }
  0x2b   : > { %p524_p3 = pnand %p523_p1, %p683_p4 }
  0x2c   : > { %p529_p12 = por %p528_p11, %p527_p10 }
  0x2d   : > { %364 = vmatpush.xpose.msk.msra.mxu0 %vm206_vm0, %v203_v2  ;;  %p525_p9 = pneg %p524_p3 }
  0x2f   : > { %p530_p13 = pnand %p529_p12, %p525_p9 }
  0x31   : > { %365 = vmatpush.xpose.msk.msra.mxu0 %vm206_vm0, %v202_v3 }
  0x34   : > { %366 = vmatmul.msk.f32.vlgmr.msra.gmra.mxu0 %vm206_vm0, %v201_v4 }
  0xb1   : > { %v239_v5 = vpop.f32.mrf.mxu0 }
  0xb2   : > { %242 = vst.msk [vmem:[%s199_s6] sm:$0xff] %vm206_vm0, %v239_v5 }
  0xb3   : > { %533 = shalt.err (!%p530_p13)
}
  0xb4   : > { %377 = dma.vmem_to_hbm [thread:$0]  (%p683_p4), %s258_s7, 128, %s260_s8, %s244_s17  }
  0xb5 PF: > { %s271_s24 = sand.u32 1, %s572_s9   ;;  %p388_p0 = pnand %p355_p6, %p691_p7 }
  0xb6   : > { %s272_s25 = scalar_lea.sflag [#allocation4], %s271_s24 }
  0xb7   : > { %p389_p2 = pneg %p388_p0 }
  0xb9   : > { %567 = dma.done.wait (%p389_p2), %s272_s25, 128  }
  0xba   : > { %569 = vsyncadd (%p389_p2), %s272_s25, 4294967168  ;;  %s19_s14 = sadd.s32 1, %s592_s14   ;;  %s770_s9 = smov %s576_s10 }
  0xbb   : > { %p16_p5 = scmp.ge.s32.totalorder %s19_s14, 4   ;;  %s771_s10 = smov %s580_s11 }
  0xbc   : > { %s772_s11 = smov %s689_s4  ;;  %s773_s12 = smov %s588_s13 }
  0xbd   : > { %s774_s13 = smov %s776_s26  ;;  %18 = sbr.rel (!%p16_p5) target bundleno = 7 (0x7), region = 78 }
  0xc2   :  { %278 = vsyncpa [#allocation3], 1 }
  0xc3   :  { %280 = vsyncpa [#allocation3 + $0x1], 1 }
  0xc4   :  { %281 = vsyncpa [#allocation6], 1 }
  0xc5   :  { %282 = vsyncpa [#allocation4], 1 }
  0xc6   :  { %284 = vsyncpa [#allocation4 + $0x1], 1 }

</bundles_post_ra>
